<compile_context>
chip_gen: v7x
topology: tpu7x:2x2x1
jax: 0.10.0
libtpu: 0.0.40
codegen_flags: <defaults>
</compile_context>

<pallas_src>
import numpy as np
import jax
import jax.numpy as jnp
from jax.experimental import pallas as pl
from jax.experimental.pallas import tpu as pltpu


_GELU_C = 0.7978845608028654  # sqrt(2 / pi)


# ----------------------------------------------------------------------------
# Kernel: grid = (row tiles, hidden chunks).  For one (TM, d_in) tile of tokens
# and one (d_in, TH) / (TH, d_out) chunk of fc1/fc2, accumulate the fc2 partial
# product into an f32 VMEM scratch; write (+ fc2 bias) on the last hidden chunk.
# ----------------------------------------------------------------------------
def mlp_kernel(x_ref, w1_ref, b1_ref, w2_ref, b2_ref, o_ref, acc_ref):
    k = pl.program_id(1)

    @pl.when(k == 0)
    def _init():
        acc_ref[...] = jnp.zeros_like(acc_ref)

    # fc1 chunk: native-dtype operands, f32 accumulation on the MXU.
    h = jnp.dot(x_ref[...], w1_ref[...], preferred_element_type=jnp.float32)
    h = h + b1_ref[...].astype(jnp.float32)                      # (TM, TH)

    # GELU (tanh approximation, exactly as the torch module), reusing h*h.
    h2 = h * h
    g = 0.5 * h * (1.0 + jnp.tanh(_GELU_C * h * (1.0 + 0.044715 * h2)))

    # fc2 partial product; cast g back to the weight dtype (no f32 MXU path).
    acc_ref[...] += jnp.dot(g.astype(w2_ref.dtype), w2_ref[...],
                            preferred_element_type=jnp.float32)

    @pl.when(k == pl.num_programs(1) - 1)
    def _finalize():
        o_ref[...] = (acc_ref[...] + b2_ref[...].astype(jnp.float32)
                      ).astype(o_ref.dtype)


# ----------------------------------------------------------------------------
# Wrapper: flatten leading dims, pick tiles, launch the tiled kernel.
# ----------------------------------------------------------------------------
def mlp_pallas(x, w1, b1, w2, b2, *, tm_max=512, th_max=512):
    """x: (..., d_in); w1: (d_in, H); b1: (H,); w2: (H, d_out); b2: (d_out,)."""
    *lead, d_in = x.shape
    H = w1.shape[1]
    d_out = w2.shape[1]
    M = int(np.prod(lead)) if lead else 1

    def round_up(a, b):
        return (a + b - 1) // b * b

    # ---- hidden-dim tiling (lane-dense multiples of 128) --------------------
    TH = min(th_max, round_up(H, 128))
    H_pad = round_up(H, TH)
    n_h = H_pad // TH
    if H_pad > H:
        # One-time weight-side padding (in a real model done at weight-prep
        # time).  Zero padding + GELU(0)==0 => exact result, no x/out padding.
        w1 = jnp.pad(w1, ((0, 0), (0, H_pad - H)))
        b1 = jnp.pad(b1, ((0, H_pad - H),))
        w2 = jnp.pad(w2, ((0, H_pad - H), (0, 0)))

    # ---- row (token) tiling --------------------------------------------------
    TM = min(tm_max, round_up(M, 8))
    if pl.cdiv(M, TM) < 2 and M > 8:
        # Guarantee >= 2 steps on the "parallel" axis (v7x has 2 TensorCores).
        TM = round_up(pl.cdiv(M, 2), 8)
    n_m = pl.cdiv(M, TM)  # ragged last block is fine: rows are independent

    x2 = x.reshape(M, d_in)
    b1_2d = b1.reshape(1, H_pad)
    b2_2d = b2.reshape(1, d_out)

    # ---- VMEM budget (explicit scoped limit, clamped to v7x's 64 MiB) -------
    in_isz = x.dtype.itemsize
    w_isz = w1.dtype.itemsize
    o_isz = in_isz
    wbuf = 1 if n_h == 1 else 2
    vmem_need = (
        2 * TM * d_in * in_isz            # x tile (double-buffered)
        + wbuf * d_in * TH * w_isz        # fc1 weight chunk(s)
        + wbuf * TH * w_isz               # fc1 bias chunk(s)
        + wbuf * TH * d_out * w_isz       # fc2 weight chunk(s)
        + d_out * w_isz                   # fc2 bias
        + 2 * TM * d_out * o_isz          # output tile (double-buffered)
        + TM * d_out * 4                  # f32 accumulator scratch
        + 2 * TM * TH * 4                 # live f32 temporaries (h, g)
    )
    vmem_limit = int(min(max(int(1.5 * vmem_need), 32 << 20), 64 << 20))

    def _build(advanced):
        def spec(shape, index_map, constant=False):
            if advanced and constant:
                # Constant-index operand: never re-fetched -> 1 buffer suffices.
                return pl.BlockSpec(shape, index_map,
                                    pipeline_mode=pl.Buffered(1))
            return pl.BlockSpec(shape, index_map)

        extra = {}
        if advanced:
            extra["cost_estimate"] = pl.CostEstimate(
                flops=2 * M * (d_in * H_pad + H_pad * d_out),
                transcendentals=M * H_pad,
                bytes_accessed=(M * d_in * in_isz + M * d_out * o_isz
                                + (d_in * H_pad + H_pad * d_out
                                   + H_pad + d_out) * w_isz),
            )

        return pl.pallas_call(
            mlp_kernel,
            out_shape=jax.ShapeDtypeStruct((M, d_out), x.dtype),
            grid=(n_m, n_h),
            in_specs=[
                spec((TM, d_in), lambda i, k: (i, 0)),                    # x
                spec((d_in, TH), lambda i, k: (0, k), constant=(n_h == 1)),  # w1
                spec((1, TH), lambda i, k: (0, k), constant=(n_h == 1)),     # b1
                spec((TH, d_out), lambda i, k: (k, 0), constant=(n_h == 1)), # w2
                spec((1, d_out), lambda i, k: (0, 0), constant=True),        # b2
            ],
            out_specs=pl.BlockSpec((TM, d_out), lambda i, k: (i, 0)),
            scratch_shapes=[pltpu.VMEM((TM, d_out), jnp.float32)],
            compiler_params=pltpu.CompilerParams(
                dimension_semantics=("parallel", "arbitrary"),
                vmem_limit_bytes=vmem_limit),
            **extra,
        )

    try:
        out = _build(True)(x2, w1, b1_2d, w2, b2_2d)
    except Exception:
        # Conservative fallback for JAX versions without pl.Buffered /
        # cost_estimate support; identical kernel & tiling.
        out = _build(False)(x2, w1, b1_2d, w2, b2_2d)

    return out.reshape(*lead, d_out)


# ----------------------------------------------------------------------------
# Pure-JAX reference (mirrors the torch forward with drop=0.0).
# ----------------------------------------------------------------------------
def mlp_reference(x, w1, b1, w2, b2):
    h = jnp.dot(x, w1) + b1
    g = 0.5 * h * (1.0 + jnp.tanh(_GELU_C * (h + 0.044715 * jnp.power(h, 3))))
    return jnp.dot(g, w2) + b2


# ----------------------------------------------------------------------------
if __name__ == "__main__":
    # Small deterministic setup: batch=2, seq=8, in=32, hidden=64, out=32.
    B, S = 2, 8
    in_features, hidden_features, out_features = 32, 64, 32

    key = jax.random.PRNGKey(0)
    kx, k1, k2, k3, k4 = jax.random.split(key, 5)

    x = jax.random.normal(kx, (B, S, in_features), jnp.float32)

    # PyTorch nn.Linear-style init: U(-1/sqrt(fan_in), 1/sqrt(fan_in)).
    lim1 = 1.0 / np.sqrt(in_features)
    lim2 = 1.0 / np.sqrt(hidden_features)
    w1 = jax.random.uniform(k1, (in_features, hidden_features), jnp.float32,
                            -lim1, lim1)
    b1 = jax.random.uniform(k2, (hidden_features,), jnp.float32, -lim1, lim1)
    w2 = jax.random.uniform(k3, (hidden_features, out_features), jnp.float32,
                            -lim2, lim2)
    b2 = jax.random.uniform(k4, (out_features,), jnp.float32, -lim2, lim2)

    out = mlp_pallas(x, w1, b1, w2, b2)
    out = jax.block_until_ready(out)

    ref = mlp_reference(x, w1, b1, w2, b2)
    ref = jax.block_until_ready(ref)

    # Tolerance covers MXU default-precision (bf16-pass) matmul numerics.
    np.testing.assert_allclose(np.asarray(out), np.asarray(ref),
                               rtol=2e-2, atol=2e-2)
    print("KERNEL_OK")
</pallas_src>

<mosaic_0001>
module attributes {stable_mosaic.version = 11 : i64} {
  func.func @mlp_kernel(%arg0: i32, %arg1: i32, %arg2: memref<8x32xf32, #tpu.memory_space<vmem>>, %arg3: memref<32x128xf32, #tpu.memory_space<vmem>>, %arg4: memref<1x128xf32, #tpu.memory_space<vmem>>, %arg5: memref<128x32xf32, #tpu.memory_space<vmem>>, %arg6: memref<1x32xf32, #tpu.memory_space<vmem>>, %arg7: memref<8x32xf32, #tpu.memory_space<vmem>>, %arg8: memref<8x32xf32, #tpu.memory_space<vmem>>) attributes {dimension_semantics = [#tpu.dimension_semantics<parallel>, #tpu.dimension_semantics<arbitrary>], iteration_bounds = array<i64: 2, 1>, scalar_prefetch = 0 : i64, scratch_operands = 1 : i64, tpu.core_type = #tpu.core_type<tc>, window_params = [{transform_indices = @transform_0, window_bounds = array<i64: 8, 32>}, {pipeline_mode = #tpu.pipeline_mode<synchronous>, transform_indices = @transform_1, window_bounds = array<i64: 32, 128>}, {pipeline_mode = #tpu.pipeline_mode<synchronous>, transform_indices = @transform_2, window_bounds = array<i64: 1, 128>}, {pipeline_mode = #tpu.pipeline_mode<synchronous>, transform_indices = @transform_3, window_bounds = array<i64: 128, 32>}, {pipeline_mode = #tpu.pipeline_mode<synchronous>, transform_indices = @transform_4, window_bounds = array<i64: 1, 32>}, {transform_indices = @transform_5, window_bounds = array<i64: 8, 32>}]} {
    %c0_i32 = arith.constant 0 : i32
    %0 = arith.cmpi eq, %arg1, %c0_i32 : i32
    %1 = arith.extui %0 : i1 to i32
    %c0_i32_0 = arith.constant 0 : i32
    %2 = arith.cmpi ne, %1, %c0_i32_0 : i32
    scf.if %2 {
      %cst_20 = arith.constant 0.000000e+00 : f32
      %31 = vector.broadcast %cst_20 : f32 to vector<8x32xf32>
      %c0_21 = arith.constant 0 : index
      %c0_22 = arith.constant 0 : index
      %32 = vector.load %arg8[%c0_21, %c0_22] : memref<8x32xf32, #tpu.memory_space<vmem>>, vector<8x32xf32>
      tpu.vector_store %arg8[%c0_21, %c0_22], %31 {strides = array<i32>} : memref<8x32xf32, #tpu.memory_space<vmem>>, vector<8x32xf32>,
    } else {
    }
    %c0 = arith.constant 0 : index
    %c0_1 = arith.constant 0 : index
    %3 = vector.load %arg2[%c0, %c0_1] : memref<8x32xf32, #tpu.memory_space<vmem>>, vector<8x32xf32>
    %c0_2 = arith.constant 0 : index
    %c0_3 = arith.constant 0 : index
    %4 = vector.load %arg3[%c0_2, %c0_3] : memref<32x128xf32, #tpu.memory_space<vmem>>, vector<32x128xf32>
    %cst = arith.constant dense<0.000000e+00> : vector<8x128xf32>
    %5 = tpu.matmul %3, %4, %cst {dimension_numbers = #tpu.dot_dimension_numbers<[1], [0], [0], [1], [0, 0, 1, 1], [], []>} : vector<8x32xf32>, vector<32x128xf32>, vector<8x128xf32> -> vector<8x128xf32>
    %c0_4 = arith.constant 0 : index
    %c0_5 = arith.constant 0 : index
    %6 = vector.load %arg4[%c0_4, %c0_5] : memref<1x128xf32, #tpu.memory_space<vmem>>, vector<1x128xf32>
    %7 = vector.broadcast %6 : vector<1x128xf32> to vector<8x128xf32>
    %8 = arith.addf %5, %7 : vector<8x128xf32>
    %9 = arith.mulf %8, %8 : vector<8x128xf32>
    %cst_6 = arith.constant 5.000000e-01 : f32
    %10 = vector.broadcast %cst_6 : f32 to vector<8x128xf32>
    %11 = arith.mulf %10, %8 : vector<8x128xf32>
    %cst_7 = arith.constant 0.797884583 : f32
    %12 = vector.broadcast %cst_7 : f32 to vector<8x128xf32>
    %13 = arith.mulf %12, %8 : vector<8x128xf32>
    %cst_8 = arith.constant 4.471500e-02 : f32
    %14 = vector.broadcast %cst_8 : f32 to vector<8x128xf32>
    %15 = arith.mulf %14, %9 : vector<8x128xf32>
    %cst_9 = arith.constant 1.000000e+00 : f32
    %16 = vector.broadcast %cst_9 : f32 to vector<8x128xf32>
    %17 = arith.addf %16, %15 : vector<8x128xf32>
    %18 = arith.mulf %13, %17 : vector<8x128xf32>
    %19 = math.tanh %18 : vector<8x128xf32>
    %cst_10 = arith.constant 1.000000e+00 : f32
    %20 = vector.broadcast %cst_10 : f32 to vector<8x128xf32>
    %21 = arith.addf %20, %19 : vector<8x128xf32>
    %22 = arith.mulf %11, %21 : vector<8x128xf32>
    %c0_11 = arith.constant 0 : index
    %c0_12 = arith.constant 0 : index
    %23 = vector.load %arg8[%c0_11, %c0_12] : memref<8x32xf32, #tpu.memory_space<vmem>>, vector<8x32xf32>
    %c0_13 = arith.constant 0 : index
    %c0_14 = arith.constant 0 : index
    %24 = vector.load %arg5[%c0_13, %c0_14] : memref<128x32xf32, #tpu.memory_space<vmem>>, vector<128x32xf32>
    %cst_15 = arith.constant dense<0.000000e+00> : vector<8x32xf32>
    %25 = tpu.matmul %22, %24, %cst_15 {dimension_numbers = #tpu.dot_dimension_numbers<[1], [0], [0], [1], [0, 0, 1, 1], [], []>} : vector<8x128xf32>, vector<128x32xf32>, vector<8x32xf32> -> vector<8x32xf32>
    %26 = arith.addf %23, %25 : vector<8x32xf32>
    %c0_16 = arith.constant 0 : index
    %c0_17 = arith.constant 0 : index
    %27 = vector.load %arg8[%c0_16, %c0_17] : memref<8x32xf32, #tpu.memory_space<vmem>>, vector<8x32xf32>
    tpu.vector_store %arg8[%c0_16, %c0_17], %26 {strides = array<i32>} : memref<8x32xf32, #tpu.memory_space<vmem>>, vector<8x32xf32>,
    %c0_i32_18 = arith.constant 0 : i32
    %28 = arith.cmpi eq, %arg1, %c0_i32_18 : i32
    %29 = arith.extui %28 : i1 to i32
    %c0_i32_19 = arith.constant 0 : i32
    %30 = arith.cmpi ne, %29, %c0_i32_19 : i32
    scf.if %30 {
      %c0_20 = arith.constant 0 : index
      %c0_21 = arith.constant 0 : index
      %31 = vector.load %arg8[%c0_20, %c0_21] : memref<8x32xf32, #tpu.memory_space<vmem>>, vector<8x32xf32>
      %c0_22 = arith.constant 0 : index
      %c0_23 = arith.constant 0 : index
      %32 = vector.load %arg6[%c0_22, %c0_23] : memref<1x32xf32, #tpu.memory_space<vmem>>, vector<1x32xf32>
      %33 = vector.broadcast %32 : vector<1x32xf32> to vector<8x32xf32>
      %34 = arith.addf %31, %33 : vector<8x32xf32>
      %c0_24 = arith.constant 0 : index
      %c0_25 = arith.constant 0 : index
      %35 = vector.load %arg7[%c0_24, %c0_25] : memref<8x32xf32, #tpu.memory_space<vmem>>, vector<8x32xf32>
      tpu.vector_store %arg7[%c0_24, %c0_25], %34 {strides = array<i32>} : memref<8x32xf32, #tpu.memory_space<vmem>>, vector<8x32xf32>,
    } else {
    }
    return
  }
  func.func @transform_0(%arg0: i32, %arg1: i32) -> (i32, i32) {
    %c0_i32 = arith.constant 0 : i32
    %c0_i32_0 = arith.constant 0 : i32
    return %arg0, %c0_i32 : i32, i32
  }
  func.func @transform_1(%arg0: i32, %arg1: i32) -> (i32, i32) {
    %c0_i32 = arith.constant 0 : i32
    %c0_i32_0 = arith.constant 0 : i32
    return %c0_i32, %arg1 : i32, i32
  }
  func.func @transform_2(%arg0: i32, %arg1: i32) -> (i32, i32) {
    %c0_i32 = arith.constant 0 : i32
    %c0_i32_0 = arith.constant 0 : i32
    return %c0_i32, %arg1 : i32, i32
  }
  func.func @transform_3(%arg0: i32, %arg1: i32) -> (i32, i32) {
    %c0_i32 = arith.constant 0 : i32
    %c0_i32_0 = arith.constant 0 : i32
    return %arg1, %c0_i32 : i32, i32
  }
  func.func @transform_4(%arg0: i32, %arg1: i32) -> (i32, i32) {
    %c0_i32 = arith.constant 0 : i32
    %c0_i32_0 = arith.constant 0 : i32
    %c0_i32_1 = arith.constant 0 : i32
    return %c0_i32, %c0_i32_0 : i32, i32
  }
  func.func @transform_5(%arg0: i32, %arg1: i32) -> (i32, i32) {
    %c0_i32 = arith.constant 0 : i32
    %c0_i32_0 = arith.constant 0 : i32
    return %arg0, %c0_i32 : i32, i32
  }
}

module attributes {stable_mosaic.version = 11 : i64} {
  func.func @mlp_kernel(%arg0: i32, %arg1: i32, %arg2: memref<8x32xf32, #tpu.memory_space<vmem>>, %arg3: memref<32x128xf32, #tpu.memory_space<vmem>>, %arg4: memref<1x128xf32, #tpu.memory_space<vmem>>, %arg5: memref<128x32xf32, #tpu.memory_space<vmem>>, %arg6: memref<1x32xf32, #tpu.memory_space<vmem>>, %arg7: memref<8x32xf32, #tpu.memory_space<vmem>>, %arg8: memref<8x32xf32, #tpu.memory_space<vmem>>) attributes {dimension_semantics = [#tpu.dimension_semantics<parallel>, #tpu.dimension_semantics<arbitrary>], iteration_bounds = array<i64: 2, 1>, scalar_prefetch = 0 : i64, scratch_operands = 1 : i64, tpu.core_type = #tpu.core_type<tc>, window_params = [{transform_indices = @transform_0, window_bounds = array<i64: 8, 32>}, {transform_indices = @transform_1, window_bounds = array<i64: 32, 128>}, {transform_indices = @transform_2, window_bounds = array<i64: 1, 128>}, {transform_indices = @transform_3, window_bounds = array<i64: 128, 32>}, {pipeline_mode = #tpu.pipeline_mode<synchronous>, transform_indices = @transform_4, window_bounds = array<i64: 1, 32>}, {transform_indices = @transform_5, window_bounds = array<i64: 8, 32>}]} {
    %c0_i32 = arith.constant 0 : i32
    %0 = arith.cmpi eq, %arg1, %c0_i32 : i32
    %1 = arith.extui %0 : i1 to i32
    %c0_i32_0 = arith.constant 0 : i32
    %2 = arith.cmpi ne, %1, %c0_i32_0 : i32
    scf.if %2 {
      %cst_20 = arith.constant 0.000000e+00 : f32
      %31 = vector.broadcast %cst_20 : f32 to vector<8x32xf32>
      %c0_21 = arith.constant 0 : index
      %c0_22 = arith.constant 0 : index
      %32 = vector.load %arg8[%c0_21, %c0_22] : memref<8x32xf32, #tpu.memory_space<vmem>>, vector<8x32xf32>
      tpu.vector_store %arg8[%c0_21, %c0_22], %31 {strides = array<i32>} : memref<8x32xf32, #tpu.memory_space<vmem>>, vector<8x32xf32>,
    } else {
    }
    %c0 = arith.constant 0 : index
    %c0_1 = arith.constant 0 : index
    %3 = vector.load %arg2[%c0, %c0_1] : memref<8x32xf32, #tpu.memory_space<vmem>>, vector<8x32xf32>
    %c0_2 = arith.constant 0 : index
    %c0_3 = arith.constant 0 : index
    %4 = vector.load %arg3[%c0_2, %c0_3] : memref<32x128xf32, #tpu.memory_space<vmem>>, vector<32x128xf32>
    %cst = arith.constant dense<0.000000e+00> : vector<8x128xf32>
    %5 = tpu.matmul %3, %4, %cst {dimension_numbers = #tpu.dot_dimension_numbers<[1], [0], [0], [1], [0, 0, 1, 1], [], []>} : vector<8x32xf32>, vector<32x128xf32>, vector<8x128xf32> -> vector<8x128xf32>
    %c0_4 = arith.constant 0 : index
    %c0_5 = arith.constant 0 : index
    %6 = vector.load %arg4[%c0_4, %c0_5] : memref<1x128xf32, #tpu.memory_space<vmem>>, vector<1x128xf32>
    %7 = vector.broadcast %6 : vector<1x128xf32> to vector<8x128xf32>
    %8 = arith.addf %5, %7 : vector<8x128xf32>
    %9 = arith.mulf %8, %8 : vector<8x128xf32>
    %cst_6 = arith.constant 5.000000e-01 : f32
    %10 = vector.broadcast %cst_6 : f32 to vector<8x128xf32>
    %11 = arith.mulf %10, %8 : vector<8x128xf32>
    %cst_7 = arith.constant 0.797884583 : f32
    %12 = vector.broadcast %cst_7 : f32 to vector<8x128xf32>
    %13 = arith.mulf %12, %8 : vector<8x128xf32>
    %cst_8 = arith.constant 4.471500e-02 : f32
    %14 = vector.broadcast %cst_8 : f32 to vector<8x128xf32>
    %15 = arith.mulf %14, %9 : vector<8x128xf32>
    %cst_9 = arith.constant 1.000000e+00 : f32
    %16 = vector.broadcast %cst_9 : f32 to vector<8x128xf32>
    %17 = arith.addf %16, %15 : vector<8x128xf32>
    %18 = arith.mulf %13, %17 : vector<8x128xf32>
    %19 = math.tanh %18 : vector<8x128xf32>
    %cst_10 = arith.constant 1.000000e+00 : f32
    %20 = vector.broadcast %cst_10 : f32 to vector<8x128xf32>
    %21 = arith.addf %20, %19 : vector<8x128xf32>
    %22 = arith.mulf %11, %21 : vector<8x128xf32>
    %c0_11 = arith.constant 0 : index
    %c0_12 = arith.constant 0 : index
    %23 = vector.load %arg8[%c0_11, %c0_12] : memref<8x32xf32, #tpu.memory_space<vmem>>, vector<8x32xf32>
    %c0_13 = arith.constant 0 : index
    %c0_14 = arith.constant 0 : index
    %24 = vector.load %arg5[%c0_13, %c0_14] : memref<128x32xf32, #tpu.memory_space<vmem>>, vector<128x32xf32>
    %cst_15 = arith.constant dense<0.000000e+00> : vector<8x32xf32>
    %25 = tpu.matmul %22, %24, %cst_15 {dimension_numbers = #tpu.dot_dimension_numbers<[1], [0], [0], [1], [0, 0, 1, 1], [], []>} : vector<8x128xf32>, vector<128x32xf32>, vector<8x32xf32> -> vector<8x32xf32>
    %26 = arith.addf %23, %25 : vector<8x32xf32>
    %c0_16 = arith.constant 0 : index
    %c0_17 = arith.constant 0 : index
    %27 = vector.load %arg8[%c0_16, %c0_17] : memref<8x32xf32, #tpu.memory_space<vmem>>, vector<8x32xf32>
    tpu.vector_store %arg8[%c0_16, %c0_17], %26 {strides = array<i32>} : memref<8x32xf32, #tpu.memory_space<vmem>>, vector<8x32xf32>,
    %c0_i32_18 = arith.constant 0 : i32
    %28 = arith.cmpi eq, %arg1, %c0_i32_18 : i32
    %29 = arith.extui %28 : i1 to i32
    %c0_i32_19 = arith.constant 0 : i32
    %30 = arith.cmpi ne, %29, %c0_i32_19 : i32
    scf.if %30 {
      %c0_20 = arith.constant 0 : index
      %c0_21 = arith.constant 0 : index
      %31 = vector.load %arg8[%c0_20, %c0_21] : memref<8x32xf32, #tpu.memory_space<vmem>>, vector<8x32xf32>
      %c0_22 = arith.constant 0 : index
      %c0_23 = arith.constant 0 : index
      %32 = vector.load %arg6[%c0_22, %c0_23] : memref<1x32xf32, #tpu.memory_space<vmem>>, vector<1x32xf32>
      %33 = vector.broadcast %32 : vector<1x32xf32> to vector<8x32xf32>
      %34 = arith.addf %31, %33 : vector<8x32xf32>
      %c0_24 = arith.constant 0 : index
      %c0_25 = arith.constant 0 : index
      %35 = vector.load %arg7[%c0_24, %c0_25] : memref<8x32xf32, #tpu.memory_space<vmem>>, vector<8x32xf32>
      tpu.vector_store %arg7[%c0_24, %c0_25], %34 {strides = array<i32>} : memref<8x32xf32, #tpu.memory_space<vmem>>, vector<8x32xf32>,
    } else {
    }
    return
  }
  func.func @transform_0(%arg0: i32, %arg1: i32) -> (i32, i32) {
    %c0_i32 = arith.constant 0 : i32
    %c0_i32_0 = arith.constant 0 : i32
    return %arg0, %c0_i32 : i32, i32
  }
  func.func @transform_1(%arg0: i32, %arg1: i32) -> (i32, i32) {
    %c0_i32 = arith.constant 0 : i32
    %c0_i32_0 = arith.constant 0 : i32
    return %c0_i32, %arg1 : i32, i32
  }
  func.func @transform_2(%arg0: i32, %arg1: i32) -> (i32, i32) {
    %c0_i32 = arith.constant 0 : i32
    %c0_i32_0 = arith.constant 0 : i32
    return %c0_i32, %arg1 : i32, i32
  }
  func.func @transform_3(%arg0: i32, %arg1: i32) -> (i32, i32) {
    %c0_i32 = arith.constant 0 : i32
    %c0_i32_0 = arith.constant 0 : i32
    return %arg1, %c0_i32 : i32, i32
  }
  func.func @transform_4(%arg0: i32, %arg1: i32) -> (i32, i32) {
    %c0_i32 = arith.constant 0 : i32
    %c0_i32_0 = arith.constant 0 : i32
    %c0_i32_1 = arith.constant 0 : i32
    return %c0_i32, %c0_i32_0 : i32, i32
  }
  func.func @transform_5(%arg0: i32, %arg1: i32) -> (i32, i32) {
    %c0_i32 = arith.constant 0 : i32
    %c0_i32_0 = arith.constant 0 : i32
    return %arg0, %c0_i32 : i32, i32
  }
}

</mosaic_0001>

<bundles_post_ra>
// kernel: tpu_custom_call.1
= control target key start
LH: loop header
LB: loop body
LE: loop exit
PB: predicated region body
PF: predicated region fallthrough
CT: control target
= control target key end

     0   :  { %10 = vsyncpa [#allocation4], 0  ;;  %s1082_s0 = inlined_call_operand.vmem [shape: f32[16,32], index: 0, kind: input, shape index: {}]   ;;  %s1083_s1 = inlined_call_operand.vmem [shape: f32[32,128], index: 1, kind: input, shape index: {}]   ;;  %s1084_s2 = inlined_call_operand.vmem [shape: f32[1,128], index: 2, kind: input, shape index: {}]   ;;  %s1085_s3 = inlined_call_operand.vmem [shape: f32[128,32], index: 3, kind: input, shape index: {}]   ;;  %s1086_s4 = inlined_call_operand.vmem [shape: f32[1,32], index: 4, kind: input, shape index: {}]   ;;  %s1087_s5 = inlined_call_operand.hbm [shape: f32[16,32], index: 5, kind: output, shape index: {}]  }
   0x1   :  { %12 = vsyncpa [#allocation4 + $0x1], 0  ;;  %s900_s18 = smov 0   ;;  %s902_s19 = smov 0  }
   0x2   :  { %s904_s20 = smov 0   ;;  %s906_s21 = smov 0  }
   0x3   :  { %s908_s22 = smov 0   ;;  %s910_s23 = smov 0  }
   0x4 LB: > { %s611_s24 = sadd.s32 4294967295, %s864_s23   ;;  %s612_s25 = sadd.s32 4294967294, %s864_s23   ;;  %s864_s23 = sphi %s910_s23, %s18_s23   ;;  %s860_s22 = sphi %s908_s22, %s1094_s22   ;;  %s856_s21 = sphi %s906_s21, %s1093_s21   ;;  %s852_s20 = sphi %s904_s20, %s1092_s20   ;;  %s848_s19 = sphi %s902_s19, %s1091_s19   ;;  %s844_s18 = sphi %s900_s18, %s1090_s18  }
   0x5   : > { %s30_s26 = sadd.s32 1, %s860_s22  ;;  %s162_s27 = sadd.s32 1, %s852_s20 }
   0x6   : > { %p32_p0 = scmp.ge.s32.totalorder %s30_s26, 2  ;;  %p172_p1 = scmp.ne.s32.totalorder %s852_s20, %s848_s19 }
   0x7   : > { %p173_p2 = scmp.eq.s32.totalorder %s611_s24, 1  ;;  %p178_p3 = scmp.ne.s32.totalorder %s848_s19, %s844_s18 }
   0x8   : > { %s1096_s26 = smov (%p32_p0, %s30_s26), 0  ;;  %p179_p5 = scmp.eq.s32.totalorder %s612_s25, 1 }
   0x9   : > { %p940_p4 = por %p173_p2, %p172_p1  ;;  %s159_s29 = ssub.s32 %s860_s22, %s1096_s26 }
   0xa   : > { %p618_p6 = scmp.ge.s32.totalorder %s864_s23, 1  ;;  %p160_p7 = scmp.eq.s32.totalorder %s159_s29, 0 }
   0xb   : > { %p947_p8 = por %p179_p5, %p178_p3  ;;  %p229_p9 = scmp.lt.s32.totalorder %s864_s23, 3 }
   0xc   : > { %s953_s6 = scalar_select %p160_p7, %s852_s20, %s162_s27  }
   0xd   : > { %p230_p10 = pnand %p618_p6, %p229_p9 }
   0xe   : > { %v292_v0 = vld [vmem:[%s1083_s1] sm:$0xff] (!%p230_p10)  ;;  %v293_v1 = vld [vmem:[%s1083_s1 + $0x8] sm:$0xff] (!%p230_p10)  ;;  %v294_v2 = vld [vmem:[%s1083_s1 + $0x10] sm:$0xff] (!%p230_p10)  ;;  %v866_v3 = vmov (!%p230_p10), 0.0|0.0   ;;  %vm867_vm0 = vmmov (!%p230_p10), 0   ;;  %v868_v6 = vmov (!%p230_p10), 0.0  }
   0xf   : > { %233 = sbr.rel (%p230_p10) target bundleno = 502 (0x1f6), region = 40  ;;  %696 = vmatprep.subr.bf16.mxu0 (!%p230_p10), %v866_v3  ;;  %v697_v4 = vpack.c.bf16 (!%p230_p10), %v293_v1, %v292_v0  ;;  %v295_v5 = vld [vmem:[%s1083_s1 + $0x18] sm:$0xff] (!%p230_p10)  ;;  %658 = vmatprep.mubr.msk.f32.mxu0 (!%p230_p10), %vm867_vm0, %v868_v6  ;;  %p268_p11 = scmp.lt.s32.totalorder (!%p230_p10), %s856_s21, 1  ;;  %vm289_vm1 = vcmask (!%p230_p10), 261120   ;;  %v387_v7 = vld [vmem:[%s1085_s3] sm:$0xff] (!%p230_p10)  ;;  %v388_v8 = vld [vmem:[%s1085_s3 + $0x8] sm:$0xff] (!%p230_p10) }
  0x10   : > { %290 = vst.msk [vmem:[#allocation2] sm:$0xff] (!%p230_p10), %vm289_vm1, %v868_v6  ;;  %702 = vmatprep.subr.bf16.mxu1 (!%p230_p10), %v866_v3  ;;  %v703_v9 = vpack.c.bf16 (!%p230_p10), %v388_v8, %v387_v7  ;;  %v389_v10 = vld [vmem:[%s1085_s3 + $0x10] sm:$0xff] (!%p230_p10)  ;;  %v390_v11 = vld [vmem:[%s1085_s3 + $0x18] sm:$0xff] (!%p230_p10)  ;;  %693 = vmatprep.mubr.msk.f32.mxu1 (!%p230_p10), %vm867_vm0, %v868_v6  ;;  %v700_v12 = vpack.c.bf16 (!%p230_p10), %v295_v5, %v294_v2  ;;  %v391_v15 = vld [vmem:[%s1085_s3 + $0x20] sm:$0xff] (!%p230_p10)  ;;  %s625_s13 = sshll.u32 (!%p230_p10), %s856_s21, 7 }
  0x11   : > { %698 = vmatpush3.bf16.msra.mxu0 (!%p230_p10), %v697_v4  ;;  %v706_v13 = vpack.c.bf16 (!%p230_p10), %v390_v11, %v389_v10  ;;  %v392_v16 = vld [vmem:[%s1085_s3 + $0x28] sm:$0xff] (!%p230_p10)  ;;  %v393_v18 = vld [vmem:[%s1085_s3 + $0x30] sm:$0xff] (!%p230_p10)  ;;  %v394_v19 = vld [vmem:[%s1085_s3 + $0x38] sm:$0xff] (!%p230_p10)  ;;  %s1034_s24 = scalar_lea.hbm (!%p230_p10), %s1087_s5, %s625_s13 }
  0x12   : > { %699 = vmatprep.subr.bf16.mxu0 (!%p230_p10), %v866_v3  ;;  %704 = vmatpush3.bf16.msra.mxu1 (!%p230_p10), %v703_v9  ;;  %v709_v17 = vpack.c.bf16 (!%p230_p10), %v392_v16, %v391_v15  ;;  %v712_v20 = vpack.c.bf16 (!%p230_p10), %v394_v19, %v393_v18  ;;  %v395_v21 = vld [vmem:[%s1085_s3 + $0x40] sm:$0xff] (!%p230_p10)  ;;  %v396_v22 = vld [vmem:[%s1085_s3 + $0x48] sm:$0xff] (!%p230_p10)  ;;  %v397_v24 = vld [vmem:[%s1085_s3 + $0x50] sm:$0xff] (!%p230_p10) }
  0x13   : > { %705 = vmatprep.subr.bf16.mxu1 (!%p230_p10), %v866_v3  ;;  %v715_v23 = vpack.c.bf16 (!%p230_p10), %v396_v22, %v395_v21  ;;  %v398_v25 = vld [vmem:[%s1085_s3 + $0x58] sm:$0xff] (!%p230_p10)  ;;  %v399_v27 = vld [vmem:[%s1085_s3 + $0x60] sm:$0xff] (!%p230_p10)  ;;  %v400_v28 = vld [vmem:[%s1085_s3 + $0x68] sm:$0xff] (!%p230_p10) }
  0x14   : > { %v718_v26 = vpack.c.bf16 (!%p230_p10), %v398_v25, %v397_v24  ;;  %v721_v29 = vpack.c.bf16 (!%p230_p10), %v400_v28, %v399_v27  ;;  %v401_v30 = vld [vmem:[%s1085_s3 + $0x70] sm:$0xff] (!%p230_p10)  ;;  %v402_v31 = vld [vmem:[%s1085_s3 + $0x78] sm:$0xff] (!%p230_p10)  ;;  %v621_v33 = vld [vmem:[%s1084_s2] ss:$0 sm:$0xff] (!%p230_p10) }
  0x15   : > { %701 = vmatpush3.bf16.msra.mxu0 (!%p230_p10), %v700_v12  ;;  %v724_v32 = vpack.c.bf16 (!%p230_p10), %v402_v31, %v401_v30  ;;  %v623_v50 = vld [vmem:[%s1086_s4] ss:$0 sm:$0xff] (!%p230_p10) }
  0x16   : > { %s269_s8 = scalar_select %p268_p11, %s856_s21, 1  ;;  %707 = vmatpush3.bf16.msra.mxu1 %v706_v13 }
  0x17   : > { %708 = vmatprep.subr.bf16.mxu1 %v866_v3  ;;  %v386_v46 = vld [vmem:[#allocation2] sm:$0xff]  ;;  %s869_s21 = smov [#allocation3]  }
  0x18   : > { %s620_s9 = sshll.u32 %s269_s8, 3  ;;  %s790_s29 = sshll.u32 %s869_s21, 4  ;;  %s791_s29 = int_to_ptr.vmem [resolvable:$false] %s790_s29 }
  0x19   : > { %s271_s12 = scalar_lea.vmem %s1082_s0, %s620_s9  ;;  %s265_s9 = sand.u32 1, %s848_s19  }
  0x1a   : > { %v291_v14 = vld [vmem:[%s271_s12] sm:$0xff]  ;;  %710 = vmatpush3.bf16.msra.mxu1 %v709_v17  ;;  %s619_s10 = sshll.u32 %s265_s9, 3  ;;  %s489_s25 = scalar_lea.sflag [#allocation4], %s265_s9 }
  0x1b   : > { %659 = vmatmul.mubr.msk.f32.vlgmr.msra.gmra.mrb[0].mxu0 %vm289_vm1, %v291_v14  ;;  %711 = vmatprep.subr.bf16.mxu1 %v866_v3  ;;  %s267_s14 = scalar_lea.vmem [#allocation3], %s619_s10  ;;  %s792_s7 = scalar_lea.vmem %s791_s29, 256 }
  0x1c   : > { %s502_s15 = sshll.u32 %s267_s14, 4  ;;  %s1036_s15 = int_to_ptr.vmem [resolvable:$true] %s502_s15 }
  0x1d   : > { %s786_s27 = scalar_lea.vmem %s1036_s15, 128  ;;  %p793_p1 = scmp.lt.s32.totalorder %s1036_s15, %s791_s29 }
  0x1e   : > { %713 = vmatpush3.bf16.msra.mxu1 %v712_v20  ;;  %p787_p12 = scmp.ne.s32.totalorder %s1036_s15, %s786_s27  ;;  %p794_p2 = scmp.lt.s32.totalorder %s792_s7, %s786_s27 }
  0x1f   : > { %714 = vmatprep.subr.bf16.mxu1 %v866_v3 }
  0x20   : > { %p788_p13 = pnand %p787_p12, %p940_p4  ;;  %p795_p3 = por %p794_p2, %p793_p1 }
  0x22   : > { %716 = vmatpush3.bf16.msra.mxu1 %v715_v23  ;;  %p789_p0 = pneg %p788_p13 }
  0x23   : > { %717 = vmatprep.subr.bf16.mxu1 %v866_v3 }
  0x24   : > { %p796_p5 = pnand %p795_p3, %p789_p0 }
  0x26   : > { %719 = vmatpush3.bf16.msra.mxu1 %v718_v26 }
  0x27   : > { %720 = vmatprep.subr.bf16.mxu1 %v866_v3 }
  0x2a   : > { %722 = vmatpush3.bf16.msra.mxu1 %v721_v29 }
  0x2b   : > { %723 = vmatprep.subr.bf16.mxu1 %v866_v3 }
  0x2e   : > { %725 = vmatpush3.bf16.msra.mxu1 %v724_v32 }
  0xee   : > { %v373_v34 = vpop.f32.mrb[0].mxu0 }
  0xef   : > { %v374_v35 = vadd.f32 %v621_v33, %v373_v34  ;;  %v660_v36 = vpop.f32.mrb[1].mxu0 }
  0xf1   : > { %v377_v37 = vmul.f32 %v374_v35, %v374_v35  ;;  %v379_v39 = vmul.f32 0.7978846, %v374_v35  ;;  %v378_v43 = vmul.f32 0.5, %v374_v35 }
  0xf3   : > { %v380_v38 = vmul.f32 0.044715, %v377_v37 }
  0xf5   : > { %v381_v40 = vadd.f32 1.0, %v380_v38 }
  0xf7   : > { %v382_v41 = vmul.f32 %v381_v40, %v379_v39 }
  0xf9   : > { %784 = vtanh.f32 %v382_v41 }
 0x103   : > { %v785_v42 = vpop.eup %784 }
 0x104   : > { %v384_v44 = vadd.f32 1.0, %v785_v42 }
 0x106   : > { %v385_v45 = vmul.f32 %v384_v44, %v378_v43 }
 0x108   : > { %694 = vmatmul.mubr.f32.vlgmr.msra.gmra.mrb[0].mxu1 %v385_v45 }
 0x1db   : > { %v469_v47 = vpop.f32.mrb[0].mxu1 }
 0x1dc   : > { %v473_v48 = vadd.f32 %v469_v47, %v386_v46  ;;  %v695_v49 = vpop.f32.mrb[1].mxu1 }
 0x1de   : > { %474 = vst.msk [vmem:[#allocation2] sm:$0xff] %vm289_vm1, %v473_v48 }
 0x1e5   : > { %v478_v51 = vld [vmem:[#allocation2] sm:$0xff] }
 0x1e6   : > { %v486_v52 = vadd.f32 %v623_v50, %v478_v51 }
 0x1e8   : > { %487 = vst.msk [vmem:[%s267_s14] sm:$0xff] %vm289_vm1, %v486_v52 }
 0x1e9   : > { %799 = shalt.err (!%p796_p5)
}
 0x1ea   : > { %s800_s8 = scalar_lea.hbm %s1034_s24, 128  ;;  %s804_s11 = scalar_lea.hbm %s1087_s5, 256 }
 0x1eb   : > { %p801_p6 = scmp.ne.s32.totalorder %s1034_s24, %s800_s8  ;;  %p805_p10 = scmp.lt.u32.totalorder %s1034_s24, %s1087_s5 }
 0x1ec   : > { %p806_p11 = scmp.lt.u32.totalorder %s804_s11, %s800_s8  ;;  %p808_p13 = scmp.lt.u32.totalorder %s800_s8, %s1034_s24 }
 0x1ed   : > { %p802_p7 = pnand %p801_p6, %p940_p4 }
 0x1ee   : > { %p807_p12 = por %p806_p11, %p805_p10 }
 0x1ef   : > { %p803_p9 = pneg %p802_p7 }
 0x1f0   : > { %p809_p0 = por %p808_p13, %p807_p12 }
 0x1f2   : > { %p810_p1 = pnand %p809_p0, %p803_p9 }
 0x1f4   : > { %813 = shalt.err (!%p810_p1)
}
 0x1f5   : > { %726 = dma.vmem_to_hbm [thread:$0]  (%p940_p4), %s1036_s15, 128, %s1034_s24, %s489_s25  }
 0x1f6 PF: > { %p732_p2 = scmp.ge.s32.totalorder %s864_s23, 2  ;;  %s514_s14 = sand.u32 1, %s844_s18  }
 0x1f7   : > { %s515_s16 = scalar_lea.sflag [#allocation4], %s514_s14 }
 0x1f8   : > { %p729_p3 = pnand %p732_p2, %p947_p8 }
 0x1fa   : > { %839 = dma.done.wait (!%p729_p3), %s515_s16, 128  }
 0x1fb   : > { %841 = vsyncadd (!%p729_p3), %s515_s16, 4294967168  ;;  %s18_s23 = sadd.s32 1, %s864_s23   ;;  %s1090_s18 = smov %s848_s19 }
 0x1fc   : > { %p15_p5 = scmp.ge.s32.totalorder %s18_s23, 4   ;;  %s1091_s19 = smov %s852_s20 }
 0x1fd   : > { %s1092_s20 = smov %s953_s6  ;;  %s1093_s21 = smov %s860_s22 }
 0x1fe   : > { %s1094_s22 = smov %s1096_s26  ;;  %17 = sbr.rel (!%p15_p5) target bundleno = 4 (0x4), region = 92 }
 0x205   :  { %520 = vsyncpa [#allocation4], 1 }
 0x206   :  { %522 = vsyncpa [#allocation4 + $0x1], 1 }

// kernel: tpu_custom_call.1
= control target key start
LH: loop header
LB: loop body
LE: loop exit
PB: predicated region body
PF: predicated region fallthrough
CT: control target
= control target key end

     0   :  { %10 = vsyncpa [#allocation4], 0  ;;  %s1082_s0 = inlined_call_operand.vmem [shape: f32[16,32], index: 0, kind: input, shape index: {}]   ;;  %s1083_s1 = inlined_call_operand.vmem [shape: f32[32,128], index: 1, kind: input, shape index: {}]   ;;  %s1084_s2 = inlined_call_operand.vmem [shape: f32[1,128], index: 2, kind: input, shape index: {}]   ;;  %s1085_s3 = inlined_call_operand.vmem [shape: f32[128,32], index: 3, kind: input, shape index: {}]   ;;  %s1086_s4 = inlined_call_operand.vmem [shape: f32[1,32], index: 4, kind: input, shape index: {}]   ;;  %s1087_s5 = inlined_call_operand.hbm [shape: f32[16,32], index: 5, kind: output, shape index: {}]  }
   0x1   :  { %12 = vsyncpa [#allocation4 + $0x1], 0  ;;  %s900_s18 = smov 0   ;;  %s902_s19 = smov 0  }
   0x2   :  { %s904_s20 = smov 0   ;;  %s906_s21 = smov 0  }
   0x3   :  { %s908_s22 = smov 0   ;;  %s910_s23 = smov 0  }
   0x4 LB: > { %s611_s24 = sadd.s32 4294967295, %s864_s23   ;;  %s612_s25 = sadd.s32 4294967294, %s864_s23   ;;  %s864_s23 = sphi %s910_s23, %s18_s23   ;;  %s860_s22 = sphi %s908_s22, %s1094_s22   ;;  %s856_s21 = sphi %s906_s21, %s1093_s21   ;;  %s852_s20 = sphi %s904_s20, %s1092_s20   ;;  %s848_s19 = sphi %s902_s19, %s1091_s19   ;;  %s844_s18 = sphi %s900_s18, %s1090_s18  }
   0x5   : > { %s30_s26 = sadd.s32 1, %s860_s22  ;;  %s162_s27 = sadd.s32 1, %s852_s20 }
   0x6   : > { %p32_p0 = scmp.ge.s32.totalorder %s30_s26, 2  ;;  %p172_p1 = scmp.ne.s32.totalorder %s852_s20, %s848_s19 }
   0x7   : > { %p173_p2 = scmp.eq.s32.totalorder %s611_s24, 1  ;;  %p178_p3 = scmp.ne.s32.totalorder %s848_s19, %s844_s18 }
   0x8   : > { %s1096_s26 = smov (%p32_p0, %s30_s26), 0  ;;  %p179_p5 = scmp.eq.s32.totalorder %s612_s25, 1 }
   0x9   : > { %p940_p4 = por %p173_p2, %p172_p1  ;;  %s159_s29 = ssub.s32 %s860_s22, %s1096_s26 }
   0xa   : > { %p618_p6 = scmp.ge.s32.totalorder %s864_s23, 1  ;;  %p160_p7 = scmp.eq.s32.totalorder %s159_s29, 0 }
   0xb   : > { %p947_p8 = por %p179_p5, %p178_p3  ;;  %p229_p9 = scmp.lt.s32.totalorder %s864_s23, 3 }
   0xc   : > { %s953_s6 = scalar_select %p160_p7, %s852_s20, %s162_s27  }
   0xd   : > { %p230_p10 = pnand %p618_p6, %p229_p9 }
   0xe   : > { %v292_v0 = vld [vmem:[%s1083_s1] sm:$0xff] (!%p230_p10)  ;;  %v293_v1 = vld [vmem:[%s1083_s1 + $0x8] sm:$0xff] (!%p230_p10)  ;;  %v294_v2 = vld [vmem:[%s1083_s1 + $0x10] sm:$0xff] (!%p230_p10)  ;;  %v866_v3 = vmov (!%p230_p10), 0.0|0.0   ;;  %vm867_vm0 = vmmov (!%p230_p10), 0   ;;  %v868_v6 = vmov (!%p230_p10), 0.0  }
   0xf   : > { %233 = sbr.rel (%p230_p10) target bundleno = 502 (0x1f6), region = 40  ;;  %696 = vmatprep.subr.bf16.mxu0 (!%p230_p10), %v866_v3  ;;  %v697_v4 = vpack.c.bf16 (!%p230_p10), %v293_v1, %v292_v0  ;;  %v295_v5 = vld [vmem:[%s1083_s1 + $0x18] sm:$0xff] (!%p230_p10)  ;;  %658 = vmatprep.mubr.msk.f32.mxu0 (!%p230_p10), %vm867_vm0, %v868_v6  ;;  %p268_p11 = scmp.lt.s32.totalorder (!%p230_p10), %s856_s21, 1  ;;  %vm289_vm1 = vcmask (!%p230_p10), 261120   ;;  %v387_v7 = vld [vmem:[%s1085_s3] sm:$0xff] (!%p230_p10)  ;;  %v388_v8 = vld [vmem:[%s1085_s3 + $0x8] sm:$0xff] (!%p230_p10) }
  0x10   : > { %290 = vst.msk [vmem:[#allocation2] sm:$0xff] (!%p230_p10), %vm289_vm1, %v868_v6  ;;  %702 = vmatprep.subr.bf16.mxu1 (!%p230_p10), %v866_v3  ;;  %v703_v9 = vpack.c.bf16 (!%p230_p10), %v388_v8, %v387_v7  ;;  %v389_v10 = vld [vmem:[%s1085_s3 + $0x10] sm:$0xff] (!%p230_p10)  ;;  %v390_v11 = vld [vmem:[%s1085_s3 + $0x18] sm:$0xff] (!%p230_p10)  ;;  %693 = vmatprep.mubr.msk.f32.mxu1 (!%p230_p10), %vm867_vm0, %v868_v6  ;;  %v700_v12 = vpack.c.bf16 (!%p230_p10), %v295_v5, %v294_v2  ;;  %v391_v15 = vld [vmem:[%s1085_s3 + $0x20] sm:$0xff] (!%p230_p10)  ;;  %s625_s13 = sshll.u32 (!%p230_p10), %s856_s21, 7 }
  0x11   : > { %698 = vmatpush3.bf16.msra.mxu0 (!%p230_p10), %v697_v4  ;;  %v706_v13 = vpack.c.bf16 (!%p230_p10), %v390_v11, %v389_v10  ;;  %v392_v16 = vld [vmem:[%s1085_s3 + $0x28] sm:$0xff] (!%p230_p10)  ;;  %v393_v18 = vld [vmem:[%s1085_s3 + $0x30] sm:$0xff] (!%p230_p10)  ;;  %v394_v19 = vld [vmem:[%s1085_s3 + $0x38] sm:$0xff] (!%p230_p10)  ;;  %s1034_s24 = scalar_lea.hbm (!%p230_p10), %s1087_s5, %s625_s13 }
  0x12   : > { %699 = vmatprep.subr.bf16.mxu0 (!%p230_p10), %v866_v3  ;;  %704 = vmatpush3.bf16.msra.mxu1 (!%p230_p10), %v703_v9  ;;  %v709_v17 = vpack.c.bf16 (!%p230_p10), %v392_v16, %v391_v15  ;;  %v712_v20 = vpack.c.bf16 (!%p230_p10), %v394_v19, %v393_v18  ;;  %v395_v21 = vld [vmem:[%s1085_s3 + $0x40] sm:$0xff] (!%p230_p10)  ;;  %v396_v22 = vld [vmem:[%s1085_s3 + $0x48] sm:$0xff] (!%p230_p10)  ;;  %v397_v24 = vld [vmem:[%s1085_s3 + $0x50] sm:$0xff] (!%p230_p10) }
  0x13   : > { %705 = vmatprep.subr.bf16.mxu1 (!%p230_p10), %v866_v3  ;;  %v715_v23 = vpack.c.bf16 (!%p230_p10), %v396_v22, %v395_v21  ;;  %v398_v25 = vld [vmem:[%s1085_s3 + $0x58] sm:$0xff] (!%p230_p10)  ;;  %v399_v27 = vld [vmem:[%s1085_s3 + $0x60] sm:$0xff] (!%p230_p10)  ;;  %v400_v28 = vld [vmem:[%s1085_s3 + $0x68] sm:$0xff] (!%p230_p10) }
  0x14   : > { %v718_v26 = vpack.c.bf16 (!%p230_p10), %v398_v25, %v397_v24  ;;  %v721_v29 = vpack.c.bf16 (!%p230_p10), %v400_v28, %v399_v27  ;;  %v401_v30 = vld [vmem:[%s1085_s3 + $0x70] sm:$0xff] (!%p230_p10)  ;;  %v402_v31 = vld [vmem:[%s1085_s3 + $0x78] sm:$0xff] (!%p230_p10)  ;;  %v621_v33 = vld [vmem:[%s1084_s2] ss:$0 sm:$0xff] (!%p230_p10) }
  0x15   : > { %701 = vmatpush3.bf16.msra.mxu0 (!%p230_p10), %v700_v12  ;;  %v724_v32 = vpack.c.bf16 (!%p230_p10), %v402_v31, %v401_v30  ;;  %v623_v50 = vld [vmem:[%s1086_s4] ss:$0 sm:$0xff] (!%p230_p10) }
  0x16   : > { %s269_s8 = scalar_select %p268_p11, %s856_s21, 1  ;;  %707 = vmatpush3.bf16.msra.mxu1 %v706_v13 }
  0x17   : > { %708 = vmatprep.subr.bf16.mxu1 %v866_v3  ;;  %v386_v46 = vld [vmem:[#allocation2] sm:$0xff]  ;;  %s869_s21 = smov [#allocation3]  }
  0x18   : > { %s620_s9 = sshll.u32 %s269_s8, 3  ;;  %s790_s29 = sshll.u32 %s869_s21, 4  ;;  %s791_s29 = int_to_ptr.vmem [resolvable:$false] %s790_s29 }
  0x19   : > { %s271_s12 = scalar_lea.vmem %s1082_s0, %s620_s9  ;;  %s265_s9 = sand.u32 1, %s848_s19  }
  0x1a   : > { %v291_v14 = vld [vmem:[%s271_s12] sm:$0xff]  ;;  %710 = vmatpush3.bf16.msra.mxu1 %v709_v17  ;;  %s619_s10 = sshll.u32 %s265_s9, 3  ;;  %s489_s25 = scalar_lea.sflag [#allocation4], %s265_s9 }
  0x1b   : > { %659 = vmatmul.mubr.msk.f32.vlgmr.msra.gmra.mrb[0].mxu0 %vm289_vm1, %v291_v14  ;;  %711 = vmatprep.subr.bf16.mxu1 %v866_v3  ;;  %s267_s14 = scalar_lea.vmem [#allocation3], %s619_s10  ;;  %s792_s7 = scalar_lea.vmem %s791_s29, 256 }
  0x1c   : > { %s502_s15 = sshll.u32 %s267_s14, 4  ;;  %s1036_s15 = int_to_ptr.vmem [resolvable:$true] %s502_s15 }
  0x1d   : > { %s786_s27 = scalar_lea.vmem %s1036_s15, 128  ;;  %p793_p1 = scmp.lt.s32.totalorder %s1036_s15, %s791_s29 }
  0x1e   : > { %713 = vmatpush3.bf16.msra.mxu1 %v712_v20  ;;  %p787_p12 = scmp.ne.s32.totalorder %s1036_s15, %s786_s27  ;;  %p794_p2 = scmp.lt.s32.totalorder %s792_s7, %s786_s27 }
  0x1f   : > { %714 = vmatprep.subr.bf16.mxu1 %v866_v3 }
  0x20   : > { %p788_p13 = pnand %p787_p12, %p940_p4  ;;  %p795_p3 = por %p794_p2, %p793_p1 }
  0x22   : > { %716 = vmatpush3.bf16.msra.mxu1 %v715_v23  ;;  %p789_p0 = pneg %p788_p13 }
  0x23   : > { %717 = vmatprep.subr.bf16.mxu1 %v866_v3 }
  0x24   : > { %p796_p5 = pnand %p795_p3, %p789_p0 }
  0x26   : > { %719 = vmatpush3.bf16.msra.mxu1 %v718_v26 }
  0x27   : > { %720 = vmatprep.subr.bf16.mxu1 %v866_v3 }
  0x2a   : > { %722 = vmatpush3.bf16.msra.mxu1 %v721_v29 }
  0x2b   : > { %723 = vmatprep.subr.bf16.mxu1 %v866_v3 }
  0x2e   : > { %725 = vmatpush3.bf16.msra.mxu1 %v724_v32 }
  0xee   : > { %v373_v34 = vpop.f32.mrb[0].mxu0 }
  0xef   : > { %v374_v35 = vadd.f32 %v621_v33, %v373_v34  ;;  %v660_v36 = vpop.f32.mrb[1].mxu0 }
  0xf1   : > { %v377_v37 = vmul.f32 %v374_v35, %v374_v35  ;;  %v379_v39 = vmul.f32 0.7978846, %v374_v35  ;;  %v378_v43 = vmul.f32 0.5, %v374_v35 }
  0xf3   : > { %v380_v38 = vmul.f32 0.044715, %v377_v37 }
  0xf5   : > { %v381_v40 = vadd.f32 1.0, %v380_v38 }
  0xf7   : > { %v382_v41 = vmul.f32 %v381_v40, %v379_v39 }
  0xf9   : > { %784 = vtanh.f32 %v382_v41 }
 0x103   : > { %v785_v42 = vpop.eup %784 }
 0x104   : > { %v384_v44 = vadd.f32 1.0, %v785_v42 }
 0x106   : > { %v385_v45 = vmul.f32 %v384_v44, %v378_v43 }
 0x108   : > { %694 = vmatmul.mubr.f32.vlgmr.msra.gmra.mrb[0].mxu1 %v385_v45 }
 0x1db   : > { %v469_v47 = vpop.f32.mrb[0].mxu1 }
 0x1dc   : > { %v473_v48 = vadd.f32 %v469_v47, %v386_v46  ;;  %v695_v49 = vpop.f32.mrb[1].mxu1 }
 0x1de   : > { %474 = vst.msk [vmem:[#allocation2] sm:$0xff] %vm289_vm1, %v473_v48 }
 0x1e5   : > { %v478_v51 = vld [vmem:[#allocation2] sm:$0xff] }
 0x1e6   : > { %v486_v52 = vadd.f32 %v623_v50, %v478_v51 }
 0x1e8   : > { %487 = vst.msk [vmem:[%s267_s14] sm:$0xff] %vm289_vm1, %v486_v52 }
 0x1e9   : > { %799 = shalt.err (!%p796_p5)
}
 0x1ea   : > { %s800_s8 = scalar_lea.hbm %s1034_s24, 128  ;;  %s804_s11 = scalar_lea.hbm %s1087_s5, 256 }
 0x1eb   : > { %p801_p6 = scmp.ne.s32.totalorder %s1034_s24, %s800_s8  ;;  %p805_p10 = scmp.lt.u32.totalorder %s1034_s24, %s1087_s5 }
 0x1ec   : > { %p806_p11 = scmp.lt.u32.totalorder %s804_s11, %s800_s8  ;;  %p808_p13 = scmp.lt.u32.totalorder %s800_s8, %s1034_s24 }
 0x1ed   : > { %p802_p7 = pnand %p801_p6, %p940_p4 }
 0x1ee   : > { %p807_p12 = por %p806_p11, %p805_p10 }
 0x1ef   : > { %p803_p9 = pneg %p802_p7 }
 0x1f0   : > { %p809_p0 = por %p808_p13, %p807_p12 }
 0x1f2   : > { %p810_p1 = pnand %p809_p0, %p803_p9 }
 0x1f4   : > { %813 = shalt.err (!%p810_p1)
}
 0x1f5   : > { %726 = dma.vmem_to_hbm [thread:$0]  (%p940_p4), %s1036_s15, 128, %s1034_s24, %s489_s25  }
 0x1f6 PF: > { %p732_p2 = scmp.ge.s32.totalorder %s864_s23, 2  ;;  %s514_s14 = sand.u32 1, %s844_s18  }
 0x1f7   : > { %s515_s16 = scalar_lea.sflag [#allocation4], %s514_s14 }
 0x1f8   : > { %p729_p3 = pnand %p732_p2, %p947_p8 }
 0x1fa   : > { %839 = dma.done.wait (!%p729_p3), %s515_s16, 128  }
 0x1fb   : > { %841 = vsyncadd (!%p729_p3), %s515_s16, 4294967168  ;;  %s18_s23 = sadd.s32 1, %s864_s23   ;;  %s1090_s18 = smov %s848_s19 }
 0x1fc   : > { %p15_p5 = scmp.ge.s32.totalorder %s18_s23, 4   ;;  %s1091_s19 = smov %s852_s20 }
 0x1fd   : > { %s1092_s20 = smov %s953_s6  ;;  %s1093_s21 = smov %s860_s22 }
 0x1fe   : > { %s1094_s22 = smov %s1096_s26  ;;  %17 = sbr.rel (!%p15_p5) target bundleno = 4 (0x4), region = 92 }
 0x205   :  { %520 = vsyncpa [#allocation4], 1 }
 0x206   :  { %522 = vsyncpa [#allocation4 + $0x1], 1 }

</bundles_post_ra>
